<compile_context>
chip_gen: v6e
topology: v6e:2x2x1
jax: 0.10.0
libtpu: 0.0.40
codegen_flags: <defaults>
</compile_context>

<pallas_src>
import math

import jax
import jax.numpy as jnp
from jax import lax
from jax.experimental import pallas as pl
from jax.experimental.pallas import tpu as pltpu

# ----------------------------------------------------------------------------
# Deterministic "config" (PointRCNN RPN defaults) and anchor mean size.
# ----------------------------------------------------------------------------
LOC_SCOPE = 3.0
LOC_BIN_SIZE = 0.5
NUM_HEAD_BIN = 12
LOC_XZ_FINE = True
MEAN_SIZE = (1.52563191462, 1.62856739989, 3.88311640418)  # (h, w, l) for 'Car'

PER_LOC_BIN_NUM = int(LOC_SCOPE / LOC_BIN_SIZE) * 2            # 12
# x_bin | z_bin | x_res | z_res | y_off | ry_bin | ry_res | size(3)
REG_CHANNELS = PER_LOC_BIN_NUM * 4 + 1 + NUM_HEAD_BIN * 2 + 3  # 76

RPN_POST_NMS_TOP_N = 64   # scaled down for the small synthetic example

# Rows (lane dim) per grid step.  2048-row f32 tiles are already ~85%+ of the
# HBM roofline on v5e/v6e, while keeping the grid long enough for >=4 pipeline
# stages per TensorCore and an even 2-TC split on v7x.
MAX_TILE_N = 2048
MIN_TILE_N = 128

TWO_PI = 2.0 * math.pi
INV_TWO_PI = 1.0 / TWO_PI


# ----------------------------------------------------------------------------
# In-kernel helper: fused bin-argmax + residual pick over the channel
# (sublane) axis of a (K, T) slab.  Two cross-sublane reductions per group.
# ----------------------------------------------------------------------------
def _bin_decode(bin_slab, res_slab, bin_scale, res_scale):
    """bin_slab, res_slab: (K, T) f32.

    Returns (1, T): argmax_c(bin_slab) * bin_scale + res_slab[argmax] * res_scale,
    computed as a single payload (c*bin_scale + res*res_scale) selected by the
    max-bin mask and min-reduced — 2 XLU reductions instead of the 3 of
    argmax (max + tie-break min) + one-hot gather (sum).

    Tie note: rows with exactly-equal maximal bin logits resolve to the
    candidate with the smallest payload rather than the first index
    (measure-zero for float network outputs; torch argmax tie behavior is
    implementation-defined anyway).
    """
    m = jnp.max(bin_slab, axis=0, keepdims=True)                       # XLU reduce 1
    iota = lax.broadcasted_iota(jnp.int32, bin_slab.shape, 0).astype(jnp.float32)
    payload = iota * bin_scale + res_slab * res_scale
    sel = jnp.where(bin_slab >= m, payload, jnp.inf)
    return jnp.min(sel, axis=0, keepdims=True)                         # XLU reduce 2


# ----------------------------------------------------------------------------
# Pallas kernel: decode_bbox_target (+ the forward's y += h/2 shift).
# Channel-first: xyz_ref (3, T), reg_ref (76, T), out_ref (7, T) f32.
# All slab reads are static ref-slices (views); stores are lane-dense rows.
# ----------------------------------------------------------------------------
def decode_kernel(xyz_ref, reg_ref, out_ref):
    f32 = jnp.float32
    nb = PER_LOC_BIN_NUM
    y_off = 4 * nb
    ry_bin_l = y_off + 1
    ry_res_l = ry_bin_l + NUM_HEAD_BIN
    size_l = ry_res_l + NUM_HEAD_BIN

    # --- xz localization: coarse bin + fine residual fused into one payload.
    #     (LOC_XZ_FINE == True in this config.) ---
    pos_x = (LOC_BIN_SIZE / 2.0 - LOC_SCOPE) + _bin_decode(
        reg_ref[0:nb, :].astype(f32), reg_ref[2 * nb:3 * nb, :].astype(f32),
        LOC_BIN_SIZE, LOC_BIN_SIZE)
    pos_z = (LOC_BIN_SIZE / 2.0 - LOC_SCOPE) + _bin_decode(
        reg_ref[nb:2 * nb, :].astype(f32), reg_ref[3 * nb:4 * nb, :].astype(f32),
        LOC_BIN_SIZE, LOC_BIN_SIZE)

    # --- y localization (direct offset; get_y_by_bin=False) ---
    pos_y = xyz_ref[1:2, :].astype(f32) + reg_ref[y_off:y_off + 1, :].astype(f32)

    # --- heading (ry); get_ry_fine=False ---
    apc = TWO_PI / NUM_HEAD_BIN
    ry = _bin_decode(reg_ref[ry_bin_l:ry_res_l, :].astype(f32),
                     reg_ref[ry_res_l:size_l, :].astype(f32),
                     apc, apc / 2.0)
    ry = ry - TWO_PI * jnp.floor(ry * INV_TWO_PI)        # ry % 2*pi (ulp-level vs mod)
    ry = jnp.where(ry > math.pi, ry - TWO_PI, ry)        # wrap to (-pi, pi]

    # --- size (h, w, l) ---
    h = reg_ref[size_l + 0:size_l + 1, :].astype(f32) * MEAN_SIZE[0] + MEAN_SIZE[0]
    w = reg_ref[size_l + 1:size_l + 2, :].astype(f32) * MEAN_SIZE[1] + MEAN_SIZE[1]
    l = reg_ref[size_l + 2:size_l + 3, :].astype(f32) * MEAN_SIZE[2] + MEAN_SIZE[2]

    # --- shift back to original coords (roi_box3d has 3 cols: no rotation) ---
    pos_x = pos_x + xyz_ref[0:1, :].astype(f32)
    pos_z = pos_z + xyz_ref[2:3, :].astype(f32)
    # forward's: proposals[:, 1] += proposals[:, 3] / 2
    pos_y = pos_y + 0.5 * h

    # Direct lane-dense row stores (no lane-masked partial stores).
    out_ref[0:1, :] = pos_x
    out_ref[1:2, :] = pos_y
    out_ref[2:3, :] = pos_z
    out_ref[3:4, :] = h
    out_ref[4:5, :] = w
    out_ref[5:6, :] = l
    out_ref[6:7, :] = ry


# ----------------------------------------------------------------------------
# Tiling: bounded padding (<~1 tile granule) and an even grid for v7x megacore.
# ----------------------------------------------------------------------------
def _tile_and_pad(n):
    n128 = max(MIN_TILE_N, ((n + 127) // 128) * 128)
    steps = -(-n128 // MAX_TILE_N)                 # ceil
    if steps > 1 and steps % 2:
        steps += 1                                  # even grid: balanced 2-TC split
    tile = min(MAX_TILE_N, ((-(-n128 // steps) + 127) // 128) * 128)
    return tile, steps * tile                       # (tile, n_pad), n_pad = steps*tile


def decode_proposals_cf(xyz_cf, reg_cf):
    """Channel-first decode.

    xyz_cf: (3, n), reg_cf: (76, n) — any float dtype (bf16 is upcast in-kernel).
    Returns (7, n) f32 decoded boxes (x, y, z, h, w, l, ry), y already +h/2.

    Channel-first inputs avoid any wrapper-side (76, n) transpose
    materialization; producers (RPN head / selection gather) should emit this
    layout directly.
    """
    n = xyz_cf.shape[1]
    tile, n_pad = _tile_and_pad(n)
    if n_pad != n:
        xyz_cf = jnp.pad(xyz_cf, ((0, 0), (0, n_pad - n)))
        reg_cf = jnp.pad(reg_cf, ((0, 0), (0, n_pad - n)))

    out_cf = pl.pallas_call(
        decode_kernel,
        out_shape=jax.ShapeDtypeStruct((7, n_pad), jnp.float32),
        grid_spec=pltpu.PrefetchScalarGridSpec(
            num_scalar_prefetch=0,
            grid=(n_pad // tile,),
            in_specs=[
                pl.BlockSpec((3, tile), lambda i: (0, i)),
                pl.BlockSpec((REG_CHANNELS, tile), lambda i: (0, i)),
            ],
            out_specs=pl.BlockSpec((7, tile), lambda i: (0, i)),
        ),
        compiler_params=pltpu.CompilerParams(
            dimension_semantics=("parallel",)),
    )(xyz_cf, reg_cf)
    return out_cf[:, :n] if n_pad != n else out_cf


# ----------------------------------------------------------------------------
# ProposalLayer.forward wrapper
# ----------------------------------------------------------------------------
def proposal_layer_forward(rpn_scores, rpn_reg, xyz):
    """
    rpn_scores: (B, N) f32, rpn_reg: (B, N, 76), xyz: (B, N, 3)
    returns (ret_bbox3d (B, M, 7), ret_scores (B, M)), M = RPN_POST_NMS_TOP_N
    """
    B, N = rpn_scores.shape
    M = min(RPN_POST_NMS_TOP_N, N)

    # TODO(synk): rotated-BEV NMS + distance bucketing replaced by pure top-k.
    top_scores, top_idx = lax.top_k(rpn_scores, M)

    # Decode-after-select: with pure top-k selection this is mathematically
    # identical to decode-then-select and cuts kernel work / HBM traffic by
    # N/M.  NOTE: revert to decode-all if real NMS is reinstated.
    xyz_sel = jnp.take_along_axis(xyz, top_idx[:, :, None], axis=1)       # (B, M, 3)
    reg_sel = jnp.take_along_axis(rpn_reg, top_idx[:, :, None], axis=1)   # (B, M, 76)

    # Only the tiny selected slab (B*M rows) is ever transposed to channel-first;
    # XLA fuses this with the gather — no full (76, N) copy is materialized.
    xyz_cf = xyz_sel.reshape(-1, 3).T                                     # (3, B*M)
    reg_cf = reg_sel.reshape(-1, REG_CHANNELS).T                          # (76, B*M)

    out_cf = decode_proposals_cf(xyz_cf, reg_cf)                          # (7, B*M)
    return out_cf.T.reshape(B, M, 7), top_scores


# ----------------------------------------------------------------------------
# Pure-JAX reference of the decode (independent, row-major) + tie mask.
# ----------------------------------------------------------------------------
def decode_reference(xyz_flat, reg_flat):
    nb = PER_LOC_BIN_NUM
    xyz_flat = xyz_flat.astype(jnp.float32)
    reg_flat = reg_flat.astype(jnp.float32)
    x_bin = jnp.argmax(reg_flat[:, 0:nb], axis=1)
    z_bin = jnp.argmax(reg_flat[:, nb:2 * nb], axis=1)
    pos_x = x_bin.astype(jnp.float32) * LOC_BIN_SIZE + LOC_BIN_SIZE / 2 - LOC_SCOPE
    pos_z = z_bin.astype(jnp.float32) * LOC_BIN_SIZE + LOC_BIN_SIZE / 2 - LOC_SCOPE
    x_res = jnp.take_along_axis(reg_flat[:, 2 * nb:3 * nb], x_bin[:, None], 1)[:, 0]
    z_res = jnp.take_along_axis(reg_flat[:, 3 * nb:4 * nb], z_bin[:, None], 1)[:, 0]
    pos_x = pos_x + x_res * LOC_BIN_SIZE
    pos_z = pos_z + z_res * LOC_BIN_SIZE
    y_off = 4 * nb
    pos_y = xyz_flat[:, 1] + reg_flat[:, y_off]
    ry_bin_l = y_off + 1
    ry_res_l = ry_bin_l + NUM_HEAD_BIN
    ry_bin = jnp.argmax(reg_flat[:, ry_bin_l:ry_bin_l + NUM_HEAD_BIN], axis=1)
    ry_res_norm = jnp.take_along_axis(
        reg_flat[:, ry_res_l:ry_res_l + NUM_HEAD_BIN], ry_bin[:, None], 1)[:, 0]
    apc = 2.0 * math.pi / NUM_HEAD_BIN
    ry = ry_bin.astype(jnp.float32) * apc + ry_res_norm * (apc / 2.0)
    ry = jnp.mod(ry, 2.0 * math.pi)
    ry = jnp.where(ry > math.pi, ry - 2.0 * math.pi, ry)
    size_l = ry_res_l + NUM_HEAD_BIN
    anchor = jnp.asarray(MEAN_SIZE, jnp.float32)
    hwl = reg_flat[:, size_l:size_l + 3] * anchor + anchor
    pos_x = pos_x + xyz_flat[:, 0]
    pos_z = pos_z + xyz_flat[:, 2]
    pos_y = pos_y + 0.5 * hwl[:, 0]
    return jnp.concatenate(
        [pos_x[:, None], pos_y[:, None], pos_z[:, None], hwl, ry[:, None]], axis=1)


def argmax_tie_free_mask(reg_flat):
    """True for rows whose three bin groups each have a unique maximum.
    Rows with exact float ties are excluded from the numeric check: argmax tie
    resolution is implementation-defined (torch first-index vs. the kernel's
    min-payload rule) and measure-zero for real network outputs."""
    def unique_max(slab):
        return jnp.sum(slab == jnp.max(slab, axis=1, keepdims=True), axis=1) == 1
    nb = PER_LOC_BIN_NUM
    ry_bin_l = 4 * nb + 1
    return (unique_max(reg_flat[:, 0:nb])
            & unique_max(reg_flat[:, nb:2 * nb])
            & unique_max(reg_flat[:, ry_bin_l:ry_bin_l + NUM_HEAD_BIN]))


def _allclose_where(a, b, row_mask, atol=1e-4, rtol=1e-4):
    ok = jnp.abs(a - b) <= atol + rtol * jnp.abs(b)
    mask = row_mask.reshape(row_mask.shape + (1,) * (a.ndim - row_mask.ndim))
    return bool(jnp.all(jnp.where(mask, ok, True)))


if __name__ == "__main__":
    B, N = 2, 256
    key = jax.random.PRNGKey(0)
    k1, k2, k3 = jax.random.split(key, 3)
    rpn_scores = jax.random.normal(k1, (B, N), dtype=jnp.float32)
    rpn_reg = jax.random.normal(k2, (B, N, REG_CHANNELS), dtype=jnp.float32)
    xyz = jax.random.normal(k3, (B, N, 3), dtype=jnp.float32) * 20.0

    bbox3d, scores = proposal_layer_forward(rpn_scores, rpn_reg, xyz)
    jax.block_until_ready((bbox3d, scores))

    # 1) Pallas decode (channel-first, decode-all path) vs. pure-JAX reference.
    #    A real channel-first RPN head would emit (76, B*N) directly; the .T
    #    below is test-harness input prep on a small array only.
    xyz_flat = xyz.reshape(-1, 3)
    reg_flat = rpn_reg.reshape(-1, REG_CHANNELS)
    props_kernel = decode_proposals_cf(xyz_flat.T, reg_flat.T).T      # (B*N, 7)
    props_ref = decode_reference(xyz_flat, reg_flat)
    tie_free = argmax_tie_free_mask(reg_flat)                         # expect all True
    assert props_kernel.shape == (B * N, 7)
    assert _allclose_where(props_kernel, props_ref, tie_free)

    # 2) forward (decode-after-select) vs. decode-all reference + top-k gather.
    M = min(RPN_POST_NMS_TOP_N, N)
    top_scores, top_idx = lax.top_k(rpn_scores, M)
    ref_bbox = jnp.take_along_axis(
        props_ref.reshape(B, N, 7), top_idx[:, :, None], axis=1)
    sel_tie_free = jnp.take_along_axis(tie_free.reshape(B, N), top_idx, axis=1)
    assert bbox3d.shape == (B, M, 7)
    assert scores.shape == (B, M)
    assert _allclose_where(bbox3d, ref_bbox, sel_tie_free)
    assert bool(jnp.allclose(scores, top_scores))

    print("KERNEL_OK")
</pallas_src>

<mosaic_0001>
module attributes {stable_mosaic.version = 11 : i64} {
  func.func @decode_kernel(%arg0: i32, %arg1: memref<3x128xf32, #tpu.memory_space<vmem>>, %arg2: memref<76x128xf32, #tpu.memory_space<vmem>>, %arg3: memref<7x128xf32, #tpu.memory_space<vmem>>) attributes {dimension_semantics = [#tpu.dimension_semantics<parallel>], iteration_bounds = array<i64: 1>, scalar_prefetch = 0 : i64, scratch_operands = 0 : i64, tpu.core_type = #tpu.core_type<tc>, window_params = [{transform_indices = @transform_0, window_bounds = array<i64: 3, 128>}, {transform_indices = @transform_1, window_bounds = array<i64: 76, 128>}, {transform_indices = @transform_2, window_bounds = array<i64: 7, 128>}]} {
    %c0 = arith.constant 0 : index
    %c0_0 = arith.constant 0 : index
    %0 = vector.load %arg2[%c0, %c0_0] : memref<76x128xf32, #tpu.memory_space<vmem>>, vector<12x128xf32>
    %c24 = arith.constant 24 : index
    %c0_1 = arith.constant 0 : index
    %1 = vector.load %arg2[%c24, %c0_1] : memref<76x128xf32, #tpu.memory_space<vmem>>, vector<12x128xf32>
    %cst = arith.constant dense<0xFF800000> : vector<128xf32>
    %2 = vector.multi_reduction <maximumf>, %0, %cst [0] : vector<12x128xf32> to vector<128xf32>
    %3 = vector.shape_cast %2 : vector<128xf32> to vector<1x128xf32>
    %4 = tpu.iota {dimensions = array<i32: 0>} : vector<12x128xi32>
    %5 = arith.sitofp %4 : vector<12x128xi32> to vector<12x128xf32>
    %cst_2 = arith.constant 5.000000e-01 : f32
    %6 = vector.broadcast %cst_2 : f32 to vector<12x128xf32>
    %7 = arith.mulf %5, %6 : vector<12x128xf32>
    %cst_3 = arith.constant 5.000000e-01 : f32
    %8 = vector.broadcast %cst_3 : f32 to vector<12x128xf32>
    %9 = arith.mulf %1, %8 : vector<12x128xf32>
    %10 = arith.addf %7, %9 : vector<12x128xf32>
    %11 = vector.broadcast %3 : vector<1x128xf32> to vector<12x128xf32>
    %12 = arith.cmpf oge, %0, %11 : vector<12x128xf32>
    %cst_4 = arith.constant 0x7F800000 : f32
    %13 = vector.broadcast %cst_4 : f32 to vector<12x128xf32>
    %14 = arith.select %12, %10, %13 : vector<12x128xi1>, vector<12x128xf32>
    %cst_5 = arith.constant dense<0x7F800000> : vector<128xf32>
    %15 = vector.multi_reduction <minimumf>, %14, %cst_5 [0] : vector<12x128xf32> to vector<128xf32>
    %16 = vector.shape_cast %15 : vector<128xf32> to vector<1x128xf32>
    %cst_6 = arith.constant -2.750000e+00 : f32
    %17 = vector.broadcast %cst_6 : f32 to vector<1x128xf32>
    %18 = arith.addf %17, %16 : vector<1x128xf32>
    %c12 = arith.constant 12 : index
    %c0_7 = arith.constant 0 : index
    %19 = vector.load %arg2[%c12, %c0_7] : memref<76x128xf32, #tpu.memory_space<vmem>>, vector<12x128xf32>
    %c36 = arith.constant 36 : index
    %c0_8 = arith.constant 0 : index
    %20 = vector.load %arg2[%c36, %c0_8] : memref<76x128xf32, #tpu.memory_space<vmem>>, vector<12x128xf32>
    %cst_9 = arith.constant dense<0xFF800000> : vector<128xf32>
    %21 = vector.multi_reduction <maximumf>, %19, %cst_9 [0] : vector<12x128xf32> to vector<128xf32>
    %22 = vector.shape_cast %21 : vector<128xf32> to vector<1x128xf32>
    %23 = tpu.iota {dimensions = array<i32: 0>} : vector<12x128xi32>
    %24 = arith.sitofp %23 : vector<12x128xi32> to vector<12x128xf32>
    %cst_10 = arith.constant 5.000000e-01 : f32
    %25 = vector.broadcast %cst_10 : f32 to vector<12x128xf32>
    %26 = arith.mulf %24, %25 : vector<12x128xf32>
    %cst_11 = arith.constant 5.000000e-01 : f32
    %27 = vector.broadcast %cst_11 : f32 to vector<12x128xf32>
    %28 = arith.mulf %20, %27 : vector<12x128xf32>
    %29 = arith.addf %26, %28 : vector<12x128xf32>
    %30 = vector.broadcast %22 : vector<1x128xf32> to vector<12x128xf32>
    %31 = arith.cmpf oge, %19, %30 : vector<12x128xf32>
    %cst_12 = arith.constant 0x7F800000 : f32
    %32 = vector.broadcast %cst_12 : f32 to vector<12x128xf32>
    %33 = arith.select %31, %29, %32 : vector<12x128xi1>, vector<12x128xf32>
    %cst_13 = arith.constant dense<0x7F800000> : vector<128xf32>
    %34 = vector.multi_reduction <minimumf>, %33, %cst_13 [0] : vector<12x128xf32> to vector<128xf32>
    %35 = vector.shape_cast %34 : vector<128xf32> to vector<1x128xf32>
    %cst_14 = arith.constant -2.750000e+00 : f32
    %36 = vector.broadcast %cst_14 : f32 to vector<1x128xf32>
    %37 = arith.addf %36, %35 : vector<1x128xf32>
    %c1 = arith.constant 1 : index
    %c0_15 = arith.constant 0 : index
    %38 = vector.load %arg1[%c1, %c0_15] : memref<3x128xf32, #tpu.memory_space<vmem>>, vector<1x128xf32>
    %c48 = arith.constant 48 : index
    %c0_16 = arith.constant 0 : index
    %39 = vector.load %arg2[%c48, %c0_16] : memref<76x128xf32, #tpu.memory_space<vmem>>, vector<1x128xf32>
    %40 = arith.addf %38, %39 : vector<1x128xf32>
    %c49 = arith.constant 49 : index
    %c0_17 = arith.constant 0 : index
    %41 = vector.load %arg2[%c49, %c0_17] : memref<76x128xf32, #tpu.memory_space<vmem>>, vector<12x128xf32>
    %c61 = arith.constant 61 : index
    %c0_18 = arith.constant 0 : index
    %42 = vector.load %arg2[%c61, %c0_18] : memref<76x128xf32, #tpu.memory_space<vmem>>, vector<12x128xf32>
    %cst_19 = arith.constant dense<0xFF800000> : vector<128xf32>
    %43 = vector.multi_reduction <maximumf>, %41, %cst_19 [0] : vector<12x128xf32> to vector<128xf32>
    %44 = vector.shape_cast %43 : vector<128xf32> to vector<1x128xf32>
    %45 = tpu.iota {dimensions = array<i32: 0>} : vector<12x128xi32>
    %46 = arith.sitofp %45 : vector<12x128xi32> to vector<12x128xf32>
    %cst_20 = arith.constant 0.52359879 : f32
    %47 = vector.broadcast %cst_20 : f32 to vector<12x128xf32>
    %48 = arith.mulf %46, %47 : vector<12x128xf32>
    %cst_21 = arith.constant 0.261799395 : f32
    %49 = vector.broadcast %cst_21 : f32 to vector<12x128xf32>
    %50 = arith.mulf %42, %49 : vector<12x128xf32>
    %51 = arith.addf %48, %50 : vector<12x128xf32>
    %52 = vector.broadcast %44 : vector<1x128xf32> to vector<12x128xf32>
    %53 = arith.cmpf oge, %41, %52 : vector<12x128xf32>
    %cst_22 = arith.constant 0x7F800000 : f32
    %54 = vector.broadcast %cst_22 : f32 to vector<12x128xf32>
    %55 = arith.select %53, %51, %54 : vector<12x128xi1>, vector<12x128xf32>
    %cst_23 = arith.constant dense<0x7F800000> : vector<128xf32>
    %56 = vector.multi_reduction <minimumf>, %55, %cst_23 [0] : vector<12x128xf32> to vector<128xf32>
    %57 = vector.shape_cast %56 : vector<128xf32> to vector<1x128xf32>
    %cst_24 = arith.constant 0.159154937 : f32
    %58 = vector.broadcast %cst_24 : f32 to vector<1x128xf32>
    %59 = arith.mulf %57, %58 : vector<1x128xf32>
    %60 = math.floor %59 : vector<1x128xf32>
    %cst_25 = arith.constant 6.28318548 : f32
    %61 = vector.broadcast %cst_25 : f32 to vector<1x128xf32>
    %62 = arith.mulf %61, %60 : vector<1x128xf32>
    %63 = arith.subf %57, %62 : vector<1x128xf32>
    %cst_26 = arith.constant 3.14159274 : f32
    %64 = vector.broadcast %cst_26 : f32 to vector<1x128xf32>
    %65 = arith.cmpf ogt, %63, %64 : vector<1x128xf32>
    %cst_27 = arith.constant 6.28318548 : f32
    %66 = vector.broadcast %cst_27 : f32 to vector<1x128xf32>
    %67 = arith.subf %63, %66 : vector<1x128xf32>
    %68 = arith.select %65, %67, %63 : vector<1x128xi1>, vector<1x128xf32>
    %c73 = arith.constant 73 : index
    %c0_28 = arith.constant 0 : index
    %69 = vector.load %arg2[%c73, %c0_28] : memref<76x128xf32, #tpu.memory_space<vmem>>, vector<1x128xf32>
    %cst_29 = arith.constant 1.5256319 : f32
    %70 = vector.broadcast %cst_29 : f32 to vector<1x128xf32>
    %71 = arith.mulf %69, %70 : vector<1x128xf32>
    %cst_30 = arith.constant 1.5256319 : f32
    %72 = vector.broadcast %cst_30 : f32 to vector<1x128xf32>
    %73 = arith.addf %71, %72 : vector<1x128xf32>
    %c74 = arith.constant 74 : index
    %c0_31 = arith.constant 0 : index
    %74 = vector.load %arg2[%c74, %c0_31] : memref<76x128xf32, #tpu.memory_space<vmem>>, vector<1x128xf32>
    %cst_32 = arith.constant 1.62856746 : f32
    %75 = vector.broadcast %cst_32 : f32 to vector<1x128xf32>
    %76 = arith.mulf %74, %75 : vector<1x128xf32>
    %cst_33 = arith.constant 1.62856746 : f32
    %77 = vector.broadcast %cst_33 : f32 to vector<1x128xf32>
    %78 = arith.addf %76, %77 : vector<1x128xf32>
    %c75 = arith.constant 75 : index
    %c0_34 = arith.constant 0 : index
    %79 = vector.load %arg2[%c75, %c0_34] : memref<76x128xf32, #tpu.memory_space<vmem>>, vector<1x128xf32>
    %cst_35 = arith.constant 3.88311648 : f32
    %80 = vector.broadcast %cst_35 : f32 to vector<1x128xf32>
    %81 = arith.mulf %79, %80 : vector<1x128xf32>
    %cst_36 = arith.constant 3.88311648 : f32
    %82 = vector.broadcast %cst_36 : f32 to vector<1x128xf32>
    %83 = arith.addf %81, %82 : vector<1x128xf32>
    %c0_37 = arith.constant 0 : index
    %c0_38 = arith.constant 0 : index
    %84 = vector.load %arg1[%c0_37, %c0_38] : memref<3x128xf32, #tpu.memory_space<vmem>>, vector<1x128xf32>
    %85 = arith.addf %18, %84 : vector<1x128xf32>
    %c2 = arith.constant 2 : index
    %c0_39 = arith.constant 0 : index
    %86 = vector.load %arg1[%c2, %c0_39] : memref<3x128xf32, #tpu.memory_space<vmem>>, vector<1x128xf32>
    %87 = arith.addf %37, %86 : vector<1x128xf32>
    %cst_40 = arith.constant 5.000000e-01 : f32
    %88 = vector.broadcast %cst_40 : f32 to vector<1x128xf32>
    %89 = arith.mulf %88, %73 : vector<1x128xf32>
    %90 = arith.addf %40, %89 : vector<1x128xf32>
    %c0_41 = arith.constant 0 : index
    %c0_42 = arith.constant 0 : index
    %91 = vector.load %arg3[%c0_41, %c0_42] : memref<7x128xf32, #tpu.memory_space<vmem>>, vector<1x128xf32>
    tpu.vector_store %arg3[%c0_41, %c0_42], %85 {strides = array<i32>} : memref<7x128xf32, #tpu.memory_space<vmem>>, vector<1x128xf32>,
    %c1_43 = arith.constant 1 : index
    %c0_44 = arith.constant 0 : index
    %92 = vector.load %arg3[%c1_43, %c0_44] : memref<7x128xf32, #tpu.memory_space<vmem>>, vector<1x128xf32>
    tpu.vector_store %arg3[%c1_43, %c0_44], %90 {strides = array<i32>} : memref<7x128xf32, #tpu.memory_space<vmem>>, vector<1x128xf32>,
    %c2_45 = arith.constant 2 : index
    %c0_46 = arith.constant 0 : index
    %93 = vector.load %arg3[%c2_45, %c0_46] : memref<7x128xf32, #tpu.memory_space<vmem>>, vector<1x128xf32>
    tpu.vector_store %arg3[%c2_45, %c0_46], %87 {strides = array<i32>} : memref<7x128xf32, #tpu.memory_space<vmem>>, vector<1x128xf32>,
    %c3 = arith.constant 3 : index
    %c0_47 = arith.constant 0 : index
    %94 = vector.load %arg3[%c3, %c0_47] : memref<7x128xf32, #tpu.memory_space<vmem>>, vector<1x128xf32>
    tpu.vector_store %arg3[%c3, %c0_47], %73 {strides = array<i32>} : memref<7x128xf32, #tpu.memory_space<vmem>>, vector<1x128xf32>,
    %c4 = arith.constant 4 : index
    %c0_48 = arith.constant 0 : index
    %95 = vector.load %arg3[%c4, %c0_48] : memref<7x128xf32, #tpu.memory_space<vmem>>, vector<1x128xf32>
    tpu.vector_store %arg3[%c4, %c0_48], %78 {strides = array<i32>} : memref<7x128xf32, #tpu.memory_space<vmem>>, vector<1x128xf32>,
    %c5 = arith.constant 5 : index
    %c0_49 = arith.constant 0 : index
    %96 = vector.load %arg3[%c5, %c0_49] : memref<7x128xf32, #tpu.memory_space<vmem>>, vector<1x128xf32>
    tpu.vector_store %arg3[%c5, %c0_49], %83 {strides = array<i32>} : memref<7x128xf32, #tpu.memory_space<vmem>>, vector<1x128xf32>,
    %c6 = arith.constant 6 : index
    %c0_50 = arith.constant 0 : index
    %97 = vector.load %arg3[%c6, %c0_50] : memref<7x128xf32, #tpu.memory_space<vmem>>, vector<1x128xf32>
    tpu.vector_store %arg3[%c6, %c0_50], %68 {strides = array<i32>} : memref<7x128xf32, #tpu.memory_space<vmem>>, vector<1x128xf32>,
    return
  }
  func.func @transform_0(%arg0: i32) -> (i32, i32) {
    %c0_i32 = arith.constant 0 : i32
    %c0_i32_0 = arith.constant 0 : i32
    return %c0_i32, %arg0 : i32, i32
  }
  func.func @transform_1(%arg0: i32) -> (i32, i32) {
    %c0_i32 = arith.constant 0 : i32
    %c0_i32_0 = arith.constant 0 : i32
    return %c0_i32, %arg0 : i32, i32
  }
  func.func @transform_2(%arg0: i32) -> (i32, i32) {
    %c0_i32 = arith.constant 0 : i32
    %c0_i32_0 = arith.constant 0 : i32
    return %c0_i32, %arg0 : i32, i32
  }
}

</mosaic_0001>

<bundles_post_ra>
// kernel: tpu_custom_call.1
= control target key start
LH: loop header
LB: loop body
LE: loop exit
PB: predicated region body
PF: predicated region fallthrough
CT: control target
= control target key end

     0   :  { %7 = vsyncpa [#allocation3], 0  ;;  %s312_s0 = inlined_call_operand.hbm [shape: f32[3,128], index: 0, kind: input, shape index: {}]   ;;  %s313_s1 = inlined_call_operand.hbm [shape: f32[76,128], index: 1, kind: input, shape index: {}]   ;;  %s314_s2 = inlined_call_operand.hbm [shape: f32[7,128], index: 2, kind: output, shape index: {}]  }
   0x1   :  { %8 = vsyncpa [#allocation6], 0 }
   0x2   :  { %9 = vsyncpa [#allocation4], 0  ;;  %s254_s9 = smov [#allocation2]   ;;  %s255_s11 = smov [#allocation5]  }
   0x3   :  { %s16_s10 = sshll.u32 %s254_s9, 4  ;;  %s25_s12 = sshll.u32 %s255_s11, 4  ;;  %s17_s10 = int_to_ptr.vmem [resolvable:$true] %s16_s10  ;;  %s26_s12 = int_to_ptr.vmem [resolvable:$true] %s25_s12 }
   0x4   :  { %s196_s13 = scalar_lea.vmem %s17_s10, 64  ;;  %p201_p1 = scmp.lt.s32.totalorder %s17_s10, %s17_s10 }
   0x5   :  { %p197_p0 = scmp.ne.s32.totalorder %s17_s10, %s196_s13  ;;  %p202_p2 = scmp.lt.s32.totalorder %s196_s13, %s196_s13 }
   0x7   :  { %p203_p3 = por %p202_p2, %p201_p1 }
   0x9   :  { %p204_p4 = pnand %p203_p3, %p197_p0 }
   0xb   :  { %207 = shalt.err (!%p204_p4)
}
   0xc   :  { %19 = dma.hbm_to_vmem [thread:$0]  %s312_s0, 64, %s17_s10, [#allocation3]  }
   0xd   :  { %s216_s16 = scalar_lea.vmem %s26_s12, 1280  ;;  %p221_p6 = scmp.lt.s32.totalorder %s26_s12, %s26_s12 }
   0xe   :  { %p217_p5 = scmp.ne.s32.totalorder %s26_s12, %s216_s16  ;;  %p222_p7 = scmp.lt.s32.totalorder %s216_s16, %s216_s16 }
  0x10   :  { %p223_p8 = por %p222_p7, %p221_p6 }
  0x12   :  { %p224_p9 = pnand %p223_p8, %p217_p5 }
  0x14   :  { %227 = shalt.err (!%p224_p9)
}
  0x15   :  { %s256_s17 = smov 128   ;;  %s257_s18 = smov 8  }
  0x16   :  { %31 = dma.hbm_to_vmem [thread:$0]  %s313_s1, 1280, %s26_s12, [#allocation6], %s256_s17, %s256_s17, %s257_s18  }
  0x17   :  { %248 = dma.done.wait [#allocation3], 64  }
  0x18   :  { %249 = vsyncadd [#allocation3], 4294967232 }
  0x19   :  { %250 = dma.done.wait [#allocation6], 1280  }
  0x1a   :  { %251 = vsyncadd [#allocation6], 4294966016  ;;  %v51_v0 = vlaneseq  ;;  %v282_v3 = vld [vmem:[#allocation5] sm:$0xff]  ;;  %v284_v4 = vld [vmem:[#allocation5 + $0x8] sm:$0xf]  ;;  %vm42_vm0 = vcmask 1043456  }
  0x1b   :  { %v43_v5 = vsel %vm42_vm0, %v284_v4, -inf  ;;  %v40_v6 = vld [vmem:[#allocation5 + $0x18] sm:$0xff]  ;;  %v289_v10 = vld [vmem:[#allocation5 + $0xc] sm:$0xff]  ;;  %v144_v13 = vld [vmem:[#allocation5 + $0x49] sm:$0x1]  ;;  %s258_s0 = smov [#allocation7]  }
  0x1c   :  { %v52_v1 = vshrl.u32 %v51_v0, 7  ;;  %v44_v7 = vmax.f32 %v282_v3, %v43_v5  ;;  %v104_v9 = vld [vmem:[#allocation2 + $0x1] sm:$0x1]  ;;  %v105_v12 = vld [vmem:[#allocation5 + $0x30] sm:$0x1]  ;;  %v58_v20 = vmul.f32 0.5, %v40_v6 }
  0x1d   :  { %v292_v14 = vld [vmem:[#allocation5 + $0x14] sm:$0xf]  ;;  %v145_v17 = vmul.f32 1.5256319, %v144_v13  ;;  %v41_v18 = vld [vmem:[#allocation5 + $0x20] sm:$0xf]  ;;  %v106_v24 = vadd.f32 %v105_v12, %v104_v9 }
  0x1e   :  { %v280_v2 = vadd.s32 8, %v52_v1  ;;  %v54_v8 = vcvt.s32.f32 %v52_v1  ;;  %v45_v15 = vrot.slane %v44_v7, 4  ;;  %v79_v21 = vsel %vm42_vm0, %v292_v14, -inf  ;;  %v296_v22 = vld [vmem:[#allocation5 + $0x31] sm:$0xff]  ;;  %v147_v27 = vld [vmem:[#allocation5 + $0x4a] sm:$0x1] }
  0x1f   :  { %v146_v25 = vadd.f32 1.5256319, %v145_v17  ;;  %v80_v26 = vmax.f32 %v289_v10, %v79_v21  ;;  %v150_v28 = vld [vmem:[#allocation5 + $0x4b] sm:$0x1]  ;;  %v148_v29 = vmul.f32 1.6285675, %v147_v27 }
  0x20   :  { %v55_v11 = vcvt.s32.f32 %v280_v2  ;;  %v56_v16 = vmul.f32 0.5, %v54_v8  ;;  %v46_v23 = vmax.f32 %v44_v7, %v45_v15  ;;  %v151_v30 = vmul.f32 3.8831165, %v150_v28  ;;  %v108_v31 = vld [vmem:[#allocation5 + $0x39] sm:$0xf]  ;;  %v77_v34 = vld [vmem:[#allocation5 + $0x24] sm:$0xff] }
  0x21   :  { %v157_v33 = vmul.f32 0.5, %v146_v25  ;;  %162 = vst [vmem:[#allocation7 + $0x3] sm:$0x1] %v146_v25  ;;  %v81_v35 = vrot.slane %v80_v26, 4  ;;  %v111_v36 = vsel %vm42_vm0, %v108_v31, -inf  ;;  %v59_v37 = vmul.f32 0.5, %v41_v18 }
  0x22   :  { %v57_v19 = vmul.f32 0.5, %v55_v11  ;;  %v47_v32 = vrot.slane %v46_v23, 2  ;;  %v149_v38 = vadd.f32 1.6285675, %v148_v29  ;;  %v152_v39 = vadd.f32 3.8831165, %v151_v30 }
  0x23   :  { %v112_v40 = vmax.f32 %v296_v22, %v111_v36  ;;  %v158_v42 = vadd.f32 %v157_v33, %v106_v24  ;;  %v78_v43 = vld [vmem:[#allocation5 + $0x2c] sm:$0xf]  ;;  %v82_v44 = vmax.f32 %v80_v26, %v81_v35  ;;  %v87_v45 = vmul.f32 0.5, %v77_v34  ;;  %v109_v49 = vld [vmem:[#allocation5 + $0x3d] sm:$0xff]  ;;  %v110_v53 = vld [vmem:[#allocation5 + $0x45] sm:$0xf] }
  0x24   :  { %v48_v41 = vmax.f32 %v46_v23, %v47_v32  ;;  %163 = vst [vmem:[#allocation7 + $0x4] sm:$0x1] %v149_v38  ;;  %164 = vst [vmem:[#allocation7 + $0x5] sm:$0x1] %v152_v39  ;;  %v60_v50 = vadd.f32 %v58_v20, %v56_v16  ;;  %v61_v51 = vadd.f32 %v59_v37, %v57_v19  ;;  %v88_v52 = vmul.f32 0.5, %v78_v43  ;;  %s172_s1 = sshll.u32 %s258_s0, 4  ;;  %s173_s1 = int_to_ptr.vmem [resolvable:$true] %s172_s1 }
  0x25   :  { %v113_v46 = vrot.slane %v112_v40, 4  ;;  %160 = vst [vmem:[#allocation7 + $0x1] sm:$0x1] %v158_v42  ;;  %v83_v48 = vrot.slane %v82_v44, 2  ;;  %v119_v57 = vmul.f32 0.5235988, %v54_v8  ;;  %v89_v58 = vadd.f32 %v87_v45, %v56_v16  ;;  %p233_p11 = scmp.lt.s32.totalorder %s173_s1, %s173_s1 }
  0x26   :  { %v49_v47 = vrot.slane %v48_v41, 1  ;;  %v120_v60 = vmul.f32 0.5235988, %v55_v11  ;;  %v121_v61 = vmul.f32 0.2617994, %v109_v49  ;;  %v90_v2 = vadd.f32 %v88_v52, %v57_v19  ;;  %s228_s21 = scalar_lea.vmem %s173_s1, 128 }
  0x27   :  { %v114_v54 = vmax.f32 %v112_v40, %v113_v46  ;;  %v84_v56 = vmax.f32 %v82_v44, %v83_v48  ;;  %v122_v63 = vmul.f32 0.2617994, %v110_v53  ;;  %v153_v33 = vld [vmem:[#allocation2] sm:$0x1]  ;;  %v155_v38 = vld [vmem:[#allocation2 + $0x2] sm:$0x1]  ;;  %p229_p10 = scmp.ne.s32.totalorder %s173_s1, %s228_s21  ;;  %p234_p12 = scmp.lt.s32.totalorder %s228_s21, %s228_s21 }
  0x28   :  { %v50_v55 = vmax.f32 %v48_v41, %v49_v47  ;;  %v123_v8 = vadd.f32 %v121_v61, %v119_v57 }
  0x29   :  { %v115_v59 = vrot.slane %v114_v54, 2  ;;  %v85_v62 = vrot.slane %v84_v56, 1  ;;  %v124_v11 = vadd.f32 %v122_v63, %v120_v60  ;;  %p235_p13 = por %p234_p12, %p233_p11 }
  0x2a   :  { %vm62_vm1 = vcmp.ge.f32.partialorder %v282_v3, %v50_v55  ;;  %vm63_vm2 = vcmp.ge.f32.partialorder %v284_v4, %v50_v55 }
  0x2b   :  { %v64_v0 = vsel %vm62_vm1, %v60_v50, inf  ;;  %v65_v1 = vsel %vm63_vm2, %v61_v51, inf  ;;  %v116_v5 = vmax.f32 %v114_v54, %v115_v59  ;;  %v86_v7 = vmax.f32 %v84_v56, %v85_v62  ;;  %p236_p0 = pnand %p235_p13, %p229_p10 }
  0x2c   :  { %v66_v6 = vsel %vm42_vm0, %v65_v1, inf }
  0x2d   :  { %v67_v9 = vmin.f32 %v64_v0, %v66_v6  ;;  %v117_v12 = vrot.slane %v116_v5, 1  ;;  %vm91_vm3 = vcmp.ge.f32.partialorder %v289_v10, %v86_v7  ;;  %vm92_vm4 = vcmp.ge.f32.partialorder %v292_v14, %v86_v7 }
  0x2e   :  { %v93_v13 = vsel %vm91_vm3, %v89_v58, inf  ;;  %v94_v4 = vsel %vm92_vm4, %v90_v2, inf }
  0x2f   :  { %v68_v3 = vrot.slane %v67_v9, 4  ;;  %v118_v15 = vmax.f32 %v116_v5, %v117_v12  ;;  %v95_v16 = vsel %vm42_vm0, %v94_v4, inf }
  0x30   :  { %v96_v18 = vmin.f32 %v93_v13, %v95_v16 }
  0x31   :  { %v69_v17 = vmin.f32 %v67_v9, %v68_v3  ;;  %vm125_vm5 = vcmp.ge.f32.partialorder %v296_v22, %v118_v15  ;;  %vm126_vm6 = vcmp.ge.f32.partialorder %v108_v31, %v118_v15 }
  0x32   :  { %v127_v19 = vsel %vm125_vm5, %v123_v8, inf  ;;  %v128_v20 = vsel %vm126_vm6, %v124_v11, inf  ;;  %v97_v23 = vrot.slane %v96_v18, 4 }
  0x33   :  { %v70_v21 = vrot.slane %v69_v17, 2  ;;  %v129_v10 = vsel %vm42_vm0, %v128_v20, inf }
  0x34   :  { %v130_v14 = vmin.f32 %v127_v19, %v129_v10  ;;  %v98_v25 = vmin.f32 %v96_v18, %v97_v23 }
  0x35   :  { %v71_v24 = vmin.f32 %v69_v17, %v70_v21 }
  0x36   :  { %v131_v26 = vrot.slane %v130_v14, 4  ;;  %v99_v28 = vrot.slane %v98_v25, 2 }
  0x37   :  { %v72_v27 = vrot.slane %v71_v24, 1 }
  0x38   :  { %v132_v29 = vmin.f32 %v130_v14, %v131_v26  ;;  %v100_v32 = vmin.f32 %v98_v25, %v99_v28 }
  0x39   :  { %v73_v30 = vmin.f32 %v71_v24, %v72_v27 }
  0x3a   :  { %v133_v34 = vrot.slane %v132_v29, 2  ;;  %v101_v22 = vrot.slane %v100_v32, 1 }
  0x3b   :  { %v74_v35 = vadd.f32 -2.75, %v73_v30 }
  0x3c   :  { %v134_v31 = vmin.f32 %v132_v29, %v133_v34  ;;  %v102_v37 = vmin.f32 %v100_v32, %v101_v22 }
  0x3d   :  { %v154_v36 = vadd.f32 %v153_v33, %v74_v35 }
  0x3e   :  { %v135_v39 = vrot.slane %v134_v31, 1  ;;  %v103_v40 = vadd.f32 -2.75, %v102_v37 }
  0x3f   :  { %159 = vst [vmem:[#allocation7] sm:$0x1] %v154_v36 }
  0x40   :  { %v136_v41 = vmin.f32 %v134_v31, %v135_v39  ;;  %v156_v42 = vadd.f32 %v155_v38, %v103_v40 }
  0x42   :  { %v137_v43 = vmul.f32 0.15915494, %v136_v41  ;;  %161 = vst [vmem:[#allocation7 + $0x2] sm:$0x1] %v156_v42 }
  0x44   :  { %v138_v44 = vfloor.f32 %v137_v43 }
  0x46   :  { %v139_v45 = vmul.f32 6.2831855, %v138_v44 }
  0x48   :  { %v140_v46 = vsub.f32 %v136_v41, %v139_v45 }
  0x4a   :  { %vm141_vm7 = vcmp.gt.f32.partialorder %v140_v46, 3.1415927  ;;  %v182_v47 = vadd.f32 -6.2831855, %v140_v46 }
  0x4c   :  { %v143_v48 = vsel %vm141_vm7, %v182_v47, %v140_v46 }
  0x4d   :  { %165 = vst [vmem:[#allocation7 + $0x6] sm:$0x1] %v143_v48 }
  0x4e   :  { %239 = shalt.err (!%p236_p0)
}
  0x4f   :  { %175 = dma.vmem_to_hbm [thread:$0]  %s173_s1, 128, %s314_s2, [#allocation4]  }
  0x50   :  { %252 = dma.done.wait [#allocation4], 128  }
  0x51   :  { %253 = vsyncadd [#allocation4], 4294967168 }
  0x52   :  { %179 = vsyncpa [#allocation3], 1 }
  0x53   :  { %180 = vsyncpa [#allocation6], 1 }
  0x54   :  { %181 = vsyncpa [#allocation4], 1 }

</bundles_post_ra>
